<compile_context>
chip_gen: v5e
topology: v5e:2x2
jax: 0.10.0
libtpu: 0.0.40
codegen_flags: <defaults>
</compile_context>

<pallas_src>
import math

import jax
import jax.numpy as jnp
from jax.experimental import pallas as pl
from jax.experimental.pallas import tpu as pltpu


# ----------------------------------------------------------------------------
# Pallas kernel: per (head, row-tile, vocab-tile)
#   h = ReLU(x @ W1 + b1)   (computed once per row-tile, cached in VMEM)
#   y = h @ W2[:, j] + b2[j]
# ----------------------------------------------------------------------------
def _ilql_heads_kernel(x_ref, w1_ref, b1_ref, w2_ref, b2_ref, o_ref, h_ref):
    # x_ref : (tm, H)    activation row tile (compute dtype, e.g. bf16)
    # w1_ref: (H, H2)    first linear weight for this head
    # b1_ref: (1, H2)    first linear bias (f32)
    # w2_ref: (H2, tn)   vocab panel of second linear weight for this head
    # b2_ref: (1, tn)    vocab slice of second linear bias (f32)
    # o_ref : (tm, tn)   output tile
    # h_ref : (tm, H2)   VMEM scratch caching ReLU(x@W1+b1) across vocab tiles

    @pl.when(pl.program_id(2) == 0)
    def _():
        h = jnp.dot(x_ref[...], w1_ref[...],
                    preferred_element_type=jnp.float32)
        h = jnp.maximum(h + b1_ref[...], 0.0)  # bias + ReLU, once per row tile
        # TODO(synk): dropout (p=0.1) is identity in eval mode; training-mode
        # stochastic dropout (pltpu.prng_random_bits) intentionally omitted.
        h_ref[...] = h.astype(h_ref.dtype)

    y = jnp.dot(h_ref[...], w2_ref[...], preferred_element_type=jnp.float32)
    o_ref[...] = (y + b2_ref[...]).astype(o_ref.dtype)


def _round_up(x, m):
    return ((x + m - 1) // m) * m


def _fused_heads_forward(x, w1s, b1s, w2s, b2s, *, out_dtype,
                         tm=256, tn=512):
    """Run all stacked heads over x with one pallas_call.

    x   : [M, H]            (compute dtype)
    w1s : [n_heads, H, H2]  (compute dtype)
    b1s : [n_heads, 1, H2]  (f32)
    w2s : [n_heads, H2, V]  (compute dtype)
    b2s : [n_heads, 1, V]   (f32)
    returns [n_heads, M, V] in out_dtype.
    """
    M, H = x.shape
    n_heads, _, H2 = w1s.shape
    V = w2s.shape[-1]

    # Clamp tiles to the problem size while respecting (8, 128) constraints.
    tm = min(tm, _round_up(M, 8))
    if V % 128 == 0:
        tn = min(tn, V)            # stays a multiple of 128 -> lane-dense vst
    else:
        tn = V                     # full last dim is always legal

    grid = (n_heads, pl.cdiv(M, tm), pl.cdiv(V, tn))

    # VMEM budget: double-buffered inputs/outputs + h scratch, with headroom.
    cb = jnp.dtype(x.dtype).itemsize
    ob = jnp.dtype(out_dtype).itemsize
    est = (2 * (tm * H * cb            # x tile
                + H * H2 * cb          # W1
                + H2 * 4               # b1
                + H2 * tn * cb         # W2 panel
                + tn * 4               # b2 slice
                + tm * tn * ob)        # output tile
           + tm * H2 * cb)             # h scratch (single-buffered)
    vmem_limit = int(min(max(2 * est, 16 << 20), 64 << 20))

    # TODO(synk): for very large H/H2 (W1 or the (tm,H2) h tile no longer
    # fitting VMEM), add a K-reduction grid axis with an f32 accumulator.
    return pl.pallas_call(
        _ilql_heads_kernel,
        out_shape=jax.ShapeDtypeStruct((n_heads, M, V), out_dtype),
        grid_spec=pltpu.PrefetchScalarGridSpec(
            num_scalar_prefetch=0,
            grid=grid,
            in_specs=[
                pl.BlockSpec((tm, H), lambda h, i, j: (i, 0)),          # x
                pl.BlockSpec((None, H, H2), lambda h, i, j: (h, 0, 0)),  # W1
                pl.BlockSpec((None, 1, H2), lambda h, i, j: (h, 0, 0)),  # b1
                pl.BlockSpec((None, H2, tn), lambda h, i, j: (h, 0, j)),  # W2
                pl.BlockSpec((None, 1, tn), lambda h, i, j: (h, 0, j)),   # b2
            ],
            out_specs=pl.BlockSpec((None, tm, tn), lambda h, i, j: (h, i, j)),
            scratch_shapes=[pltpu.VMEM((tm, H2), x.dtype)],
        ),
        compiler_params=pltpu.CompilerParams(
            dimension_semantics=("parallel", "parallel", "arbitrary"),
            vmem_limit_bytes=vmem_limit,
        ),
    )(x, w1s, b1s, w2s, b2s)


# ----------------------------------------------------------------------------
# Parameter initialization (deterministic, PyTorch nn.Linear-style uniform)
# ----------------------------------------------------------------------------
def _init_linear(key, fan_in, fan_out, dtype=jnp.float32):
    kw, kb = jax.random.split(key)
    bound = 1.0 / math.sqrt(fan_in)
    # stored as [in, out] (transpose of PyTorch layout) so y = x @ W + b
    w = jax.random.uniform(kw, (fan_in, fan_out), dtype, -bound, bound)
    b = jax.random.uniform(kb, (fan_out,), dtype, -bound, bound)
    return w, b


def init_ilql_heads(key, hidden_size, vocab_size, n_vs=1, dtype=jnp.float32):
    q_heads = []
    for _ in range(n_vs):
        k1, k2, key = jax.random.split(key, 3)
        w1, b1 = _init_linear(k1, hidden_size, hidden_size * 2, dtype)
        w2, b2 = _init_linear(k2, hidden_size * 2, vocab_size, dtype)
        q_heads.append({"w1": w1, "b1": b1, "w2": w2, "b2": b2})
    # target_q_heads = deepcopy(q_heads) -> identical parameters
    target_q_heads = [
        {k: jnp.array(v) for k, v in head.items()} for head in q_heads
    ]
    return q_heads, target_q_heads


# ----------------------------------------------------------------------------
# ILQLHeads forward
# ----------------------------------------------------------------------------
def ilql_heads_forward(hs, q_heads, target_q_heads, *,
                       compute_dtype=jnp.bfloat16, tm=256, tn=512):
    """
    Args:
        hs: [bsz, seq_len, hidden_size]
    Returns:
        (qs, target_qs, None) where qs / target_qs are tuples of
        [bsz, seq_len, vocab_size] arrays (one per head).
    """
    bsz, seq_len, hidden = hs.shape
    M = bsz * seq_len
    hs_flat = hs.reshape(M, hidden)

    heads = list(q_heads) + list(target_q_heads)
    n_heads = len(heads)
    w1s = jnp.stack([p["w1"] for p in heads]).astype(compute_dtype)
    b1s = jnp.stack([p["b1"].reshape(1, -1) for p in heads]).astype(jnp.float32)
    w2s = jnp.stack([p["w2"] for p in heads]).astype(compute_dtype)
    b2s = jnp.stack([p["b2"].reshape(1, -1) for p in heads]).astype(jnp.float32)

    out = _fused_heads_forward(
        hs_flat.astype(compute_dtype), w1s, b1s, w2s, b2s,
        out_dtype=hs.dtype, tm=tm, tn=tn)

    V = w2s.shape[-1]
    out = out.reshape(n_heads, bsz, seq_len, V)
    n_vs = len(q_heads)
    qs = tuple(out[i] for i in range(n_vs))
    target_qs = tuple(out[n_vs + i] for i in range(n_vs))
    assert len(qs) == 1, "the current implementation only supports n_qs == 1"
    return qs, target_qs, None


# ----------------------------------------------------------------------------
# Pure-JAX references for sanity checking
# ----------------------------------------------------------------------------
def _head_forward_ref_f32(x, p):
    h = jnp.maximum(x @ p["w1"] + p["b1"], 0.0)
    return h @ p["w2"] + p["b2"]


def _head_forward_ref_bf16(x, p):
    f32 = jnp.float32
    xb = x.astype(jnp.bfloat16).astype(f32)
    w1 = p["w1"].astype(jnp.bfloat16).astype(f32)
    w2 = p["w2"].astype(jnp.bfloat16).astype(f32)
    h = jnp.maximum(xb @ w1 + p["b1"], 0.0)
    h = h.astype(jnp.bfloat16).astype(f32)
    return h @ w2 + p["b2"]


if __name__ == "__main__":
    bsz, seq_len, hidden_size, vocab_size = 2, 8, 32, 128
    n_vs = 1

    key = jax.random.PRNGKey(0)
    k_params, k_hs = jax.random.split(key)

    q_heads, target_q_heads = init_ilql_heads(
        k_params, hidden_size, vocab_size, n_vs=n_vs
    )
    hs = jax.random.normal(k_hs, (bsz, seq_len, hidden_size), jnp.float32)

    qs, target_qs, extra = ilql_heads_forward(hs, q_heads, target_q_heads)
    jax.block_until_ready(qs)
    jax.block_until_ready(target_qs)

    assert qs[0].shape == (bsz, seq_len, vocab_size)
    assert target_qs[0].shape == (bsz, seq_len, vocab_size)
    assert extra is None

    hs_flat = hs.reshape(bsz * seq_len, hidden_size)

    # bf16-aware reference: should match the kernel closely.
    ref_bf16 = _head_forward_ref_bf16(hs_flat, q_heads[0]).reshape(
        bsz, seq_len, vocab_size
    )
    assert jnp.allclose(qs[0], ref_bf16, atol=2e-3, rtol=2e-3), (
        float(jnp.max(jnp.abs(qs[0] - ref_bf16))))

    # full f32 reference: loose tolerance (bf16 quantization of operands).
    ref_f32 = _head_forward_ref_f32(hs_flat, q_heads[0]).reshape(
        bsz, seq_len, vocab_size
    )
    assert jnp.allclose(qs[0], ref_f32, atol=3e-2, rtol=3e-2), (
        float(jnp.max(jnp.abs(qs[0] - ref_f32))))

    # target heads are deepcopies -> identical outputs.
    assert jnp.allclose(qs[0], target_qs[0], atol=1e-6)

    print("KERNEL_OK")
</pallas_src>

<mosaic_0001>
module attributes {stable_mosaic.version = 11 : i64} {
  func.func @_ilql_heads_kernel(%arg0: i32, %arg1: i32, %arg2: i32, %arg3: memref<16x32xbf16, #tpu.memory_space<vmem>>, %arg4: memref<1x32x64xbf16, #tpu.memory_space<vmem>>, %arg5: memref<1x1x64xf32, #tpu.memory_space<vmem>>, %arg6: memref<1x64x128xbf16, #tpu.memory_space<vmem>>, %arg7: memref<1x1x128xf32, #tpu.memory_space<vmem>>, %arg8: memref<1x16x128xf32, #tpu.memory_space<vmem>>, %arg9: memref<16x64xbf16, #tpu.memory_space<vmem>>) attributes {dimension_semantics = [#tpu.dimension_semantics<parallel>, #tpu.dimension_semantics<parallel>, #tpu.dimension_semantics<arbitrary>], iteration_bounds = array<i64: 2, 1, 1>, scalar_prefetch = 0 : i64, scratch_operands = 1 : i64, tpu.core_type = #tpu.core_type<tc>, window_params = [{transform_indices = @transform_0, window_bounds = array<i64: 16, 32>}, {transform_indices = @transform_1, window_bounds = array<i64: 1, 32, 64>}, {transform_indices = @transform_2, window_bounds = array<i64: 1, 1, 64>}, {transform_indices = @transform_3, window_bounds = array<i64: 1, 64, 128>}, {transform_indices = @transform_4, window_bounds = array<i64: 1, 1, 128>}, {transform_indices = @transform_5, window_bounds = array<i64: 1, 16, 128>}]} {
    %c0_i32 = arith.constant 0 : i32
    %0 = arith.cmpi eq, %arg2, %c0_i32 : i32
    %1 = arith.extui %0 : i1 to i32
    %c0_i32_0 = arith.constant 0 : i32
    %2 = arith.cmpi ne, %1, %c0_i32_0 : i32
    scf.if %2 {
      %c0_11 = arith.constant 0 : index
      %c0_12 = arith.constant 0 : index
      %14 = vector.load %arg3[%c0_11, %c0_12] : memref<16x32xbf16, #tpu.memory_space<vmem>>, vector<16x32xbf16>
      %c0_13 = arith.constant 0 : index
      %c0_14 = arith.constant 0 : index
      %c0_15 = arith.constant 0 : index
      %15 = vector.load %arg4[%c0_13, %c0_14, %c0_15] : memref<1x32x64xbf16, #tpu.memory_space<vmem>>, vector<1x32x64xbf16>
      %16 = vector.shape_cast %15 : vector<1x32x64xbf16> to vector<32x64xbf16>
      %cst_16 = arith.constant dense<0.000000e+00> : vector<16x64xf32>
      %17 = tpu.matmul %14, %16, %cst_16 {dimension_numbers = #tpu.dot_dimension_numbers<[1], [0], [0], [1], [0, 0, 1, 1], [], []>} : vector<16x32xbf16>, vector<32x64xbf16>, vector<16x64xf32> -> vector<16x64xf32>
      %c0_17 = arith.constant 0 : index
      %c0_18 = arith.constant 0 : index
      %c0_19 = arith.constant 0 : index
      %18 = vector.load %arg5[%c0_17, %c0_18, %c0_19] : memref<1x1x64xf32, #tpu.memory_space<vmem>>, vector<1x1x64xf32>
      %19 = vector.shape_cast %18 : vector<1x1x64xf32> to vector<1x64xf32>
      %20 = vector.broadcast %19 : vector<1x64xf32> to vector<16x64xf32>
      %21 = arith.addf %17, %20 : vector<16x64xf32>
      %cst_20 = arith.constant 0.000000e+00 : f32
      %22 = vector.broadcast %cst_20 : f32 to vector<16x64xf32>
      %23 = arith.maximumf %21, %22 : vector<16x64xf32>
      %24 = arith.truncf %23 : vector<16x64xf32> to vector<16x64xbf16>
      %c0_21 = arith.constant 0 : index
      %c0_22 = arith.constant 0 : index
      %25 = vector.load %arg9[%c0_21, %c0_22] : memref<16x64xbf16, #tpu.memory_space<vmem>>, vector<16x64xbf16>
      tpu.vector_store %arg9[%c0_21, %c0_22], %24 {strides = array<i32>} : memref<16x64xbf16, #tpu.memory_space<vmem>>, vector<16x64xbf16>,
    } else {
    }
    %c0 = arith.constant 0 : index
    %c0_1 = arith.constant 0 : index
    %3 = vector.load %arg9[%c0, %c0_1] : memref<16x64xbf16, #tpu.memory_space<vmem>>, vector<16x64xbf16>
    %c0_2 = arith.constant 0 : index
    %c0_3 = arith.constant 0 : index
    %c0_4 = arith.constant 0 : index
    %4 = vector.load %arg6[%c0_2, %c0_3, %c0_4] : memref<1x64x128xbf16, #tpu.memory_space<vmem>>, vector<1x64x128xbf16>
    %5 = vector.shape_cast %4 : vector<1x64x128xbf16> to vector<64x128xbf16>
    %cst = arith.constant dense<0.000000e+00> : vector<16x128xf32>
    %6 = tpu.matmul %3, %5, %cst {dimension_numbers = #tpu.dot_dimension_numbers<[1], [0], [0], [1], [0, 0, 1, 1], [], []>} : vector<16x64xbf16>, vector<64x128xbf16>, vector<16x128xf32> -> vector<16x128xf32>
    %c0_5 = arith.constant 0 : index
    %c0_6 = arith.constant 0 : index
    %c0_7 = arith.constant 0 : index
    %7 = vector.load %arg7[%c0_5, %c0_6, %c0_7] : memref<1x1x128xf32, #tpu.memory_space<vmem>>, vector<1x1x128xf32>
    %8 = vector.shape_cast %7 : vector<1x1x128xf32> to vector<1x128xf32>
    %9 = vector.broadcast %8 : vector<1x128xf32> to vector<16x128xf32>
    %10 = arith.addf %6, %9 : vector<16x128xf32>
    %c0_8 = arith.constant 0 : index
    %c0_9 = arith.constant 0 : index
    %c0_10 = arith.constant 0 : index
    %11 = vector.load %arg8[%c0_8, %c0_9, %c0_10] : memref<1x16x128xf32, #tpu.memory_space<vmem>>, vector<1x16x128xf32>
    %12 = vector.shape_cast %11 : vector<1x16x128xf32> to vector<16x128xf32>
    %13 = vector.shape_cast %10 : vector<16x128xf32> to vector<1x16x128xf32>
    tpu.vector_store %arg8[%c0_8, %c0_9, %c0_10], %13 {strides = array<i32>} : memref<1x16x128xf32, #tpu.memory_space<vmem>>, vector<1x16x128xf32>,
    return
  }
  func.func @transform_0(%arg0: i32, %arg1: i32, %arg2: i32) -> (i32, i32) {
    %c0_i32 = arith.constant 0 : i32
    %c0_i32_0 = arith.constant 0 : i32
    return %arg1, %c0_i32 : i32, i32
  }
  func.func @transform_1(%arg0: i32, %arg1: i32, %arg2: i32) -> (i32, i32, i32) {
    %c0_i32 = arith.constant 0 : i32
    %c0_i32_0 = arith.constant 0 : i32
    %c0_i32_1 = arith.constant 0 : i32
    return %arg0, %c0_i32, %c0_i32_0 : i32, i32, i32
  }
  func.func @transform_2(%arg0: i32, %arg1: i32, %arg2: i32) -> (i32, i32, i32) {
    %c0_i32 = arith.constant 0 : i32
    %c0_i32_0 = arith.constant 0 : i32
    %c0_i32_1 = arith.constant 0 : i32
    return %arg0, %c0_i32, %c0_i32_0 : i32, i32, i32
  }
  func.func @transform_3(%arg0: i32, %arg1: i32, %arg2: i32) -> (i32, i32, i32) {
    %c0_i32 = arith.constant 0 : i32
    %c0_i32_0 = arith.constant 0 : i32
    return %arg0, %c0_i32, %arg2 : i32, i32, i32
  }
  func.func @transform_4(%arg0: i32, %arg1: i32, %arg2: i32) -> (i32, i32, i32) {
    %c0_i32 = arith.constant 0 : i32
    %c0_i32_0 = arith.constant 0 : i32
    return %arg0, %c0_i32, %arg2 : i32, i32, i32
  }
  func.func @transform_5(%arg0: i32, %arg1: i32, %arg2: i32) -> (i32, i32, i32) {
    %c0_i32 = arith.constant 0 : i32
    return %arg0, %arg1, %arg2 : i32, i32, i32
  }
}

</mosaic_0001>

<bundles_post_ra>
// kernel: tpu_custom_call.1
= control target key start
LH: loop header
LB: loop body
LE: loop exit
PB: predicated region body
PF: predicated region fallthrough
CT: control target
= control target key end

     0   :  { %s1296_s0 = inlined_call_operand.hbm [shape: bf16[16,32], index: 0, kind: input, shape index: {}]   ;;  %s1297_s1 = inlined_call_operand.hbm [shape: bf16[2,32,64], index: 1, kind: input, shape index: {}]   ;;  %s1298_s2 = inlined_call_operand.hbm [shape: f32[2,1,64], index: 2, kind: input, shape index: {}]   ;;  %s1299_s3 = inlined_call_operand.hbm [shape: bf16[2,64,128], index: 3, kind: input, shape index: {}]   ;;  %s1300_s4 = inlined_call_operand.vmem [shape: f32[2,1,128], index: 4, kind: input, shape index: {}]   ;;  %s1301_s5 = inlined_call_operand.hbm [shape: f32[2,16,128], index: 5, kind: output, shape index: {}]  }
   0x1   :  { %1310 = sst [smem:[#allocation20_spill]] %s1296_s0 }
   0x2   :  { %1311 = sst [smem:[#allocation21_spill]] %s1297_s1 }
   0x3   :  { %1312 = sst [smem:[#allocation22_spill]] %s1298_s2 }
   0x4   :  { %10 = vsyncpa [#allocation4], 0 }
   0x5   :  { %11 = vsyncpa [#allocation7], 0 }
   0x6   :  { %13 = vsyncpa [#allocation7 + $0x1], 0 }
   0x7   :  { %14 = vsyncpa [#allocation10], 0 }
   0x8   :  { %16 = vsyncpa [#allocation10 + $0x1], 0 }
   0x9   :  { %17 = vsyncpa [#allocation5], 0 }
   0xa   :  { %19 = vsyncpa [#allocation5 + $0x1], 0  ;;  %s1093_s18 = smov 0   ;;  %s1095_s19 = smov 0  }
   0xb   :  { %s1097_s20 = smov 0   ;;  %s1099_s21 = smov 0  }
   0xc   :  { %s1101_s22 = smov 0   ;;  %s1103_s23 = smov 0  }
   0xd LB: > { %1313 = sst [smem:[#allocation16_spill]] %s1044_s20  ;;  %s44_s24 = sadd.s32 1, %s1052_s22  ;;  %s1056_s23 = sphi %s1103_s23, %s25_s23   ;;  %s1052_s22 = sphi %s1101_s22, %s1335_s22   ;;  %s1048_s21 = sphi %s1099_s21, %s1334_s21   ;;  %s1044_s20 = sphi %s1097_s20, %s1330_s20   ;;  %s1040_s19 = sphi %s1095_s19, %s1333_s19   ;;  %s1036_s18 = sphi %s1093_s18, %s1332_s18  }
   0xe   : > { %1314 = sst [smem:[#allocation17_spill]] %s1056_s23  ;;  %s77_s25 = sadd.s32 1, %s1044_s20 }
   0xf   : > { %p46_p0 = scmp.ge.s32.totalorder %s44_s24, 2  ;;  %p84_p1 = scmp.ne.s32.totalorder %s1044_s20, %s1040_s19 }
  0x10   : > { %p85_p2 = scmp.eq.s32.totalorder %s1056_s23, 0  ;;  %p695_p4 = scmp.ge.s32.totalorder %s1056_s23, 2 }
  0x11   : > { %s1337_s24 = smov (%p46_p0, %s44_s24), 0  ;;  %p788_p6 = scmp.lt.s32.totalorder %s1056_s23, 2 }
  0x12   : > { %1315 = sst [smem:[#allocation18_spill]] %s1337_s24  ;;  %p1133_p3 = por %p85_p2, %p84_p1 }
  0x13   : > { %s74_s27 = ssub.s32 %s1052_s22, %s1337_s24  ;;  %s243_s28 = sand.u32 1, %s1056_s23  }
  0x14   : > { %p75_p5 = scmp.eq.s32.totalorder %s74_s27, 0  ;;  %s1143_s29 = sand.u32 1, %s1044_s20  }
  0x15   : > { %s696_s6 = sshll.u32 %s1143_s29, 4  ;;  %s746_s7 = sshll.u32 %s1052_s22, 4 }
  0x16   : > { %s1146_s30 = scalar_select %p75_p5, %s1044_s20, %s77_s25  }
  0x17   : > { %s1318_s1 = sld [smem:[#allocation21_spill]]  ;;  %s247_s11 = scalar_lea.vmem [#allocation6], %s696_s6 }
  0x18   : > { %1317 = sst [smem:[#allocation19_spill]] %s1146_s30  ;;  %s255_s12 = sshll.u32 %s247_s11, 4  ;;  %s256_s12 = int_to_ptr.vmem [resolvable:$true] %s255_s12 }
  0x19   : > { %p1155_p7 = pnand %p788_p6, %p1133_p3  ;;  %s1159_s15 = scalar_lea.sflag [#allocation7], %s243_s28 }
  0x1a   : > { %s1302_s16 = smov 64   ;;  %s1304_s17 = smov 4  }
  0x1b   : > { %s1168_s25 = sadd.s32 4294967295, %s1056_s23   ;;  %s692_s26 = sadd.s32 4294967294, %s1056_s23  }
  0x1c   : > { %p90_p8 = scmp.ne.s32.totalorder %s1040_s19, %s1036_s18  ;;  %p91_p9 = scmp.eq.s32.totalorder %s1168_s25, 0 }
  0x1d   : > { %s252_s10 = scalar_lea.hbm %s1318_s1, %s746_s7  ;;  %p200_p10 = scmp.eq.s32.totalorder %s1168_s25, 1 }
  0x1e   : > { %s253_s13 = sshll.u32 %s252_s10, 4  ;;  %p206_p11 = scmp.eq.s32.totalorder %s692_s26, 1  ;;  %s254_s13 = int_to_ptr.hbm [resolvable:$true] %s253_s13 }
  0x1f   : > { %776 = dma.hbm_to_vmem [thread:$0]  (!%p1155_p7), %s254_s13, 256, %s256_s12, %s1159_s15, %s1302_s16, %s1302_s16, %s1304_s17  }
  0x20   : > { %p693_p12 = scmp.ge.s32.totalorder %s1056_s23, 1  ;;  %p1178_p13 = por %p91_p9, %p90_p8 }
  0x21   : > { %p1185_p0 = por %p200_p10, %p84_p1  ;;  %p1189_p2 = por %p206_p11, %p90_p8 }
  0x22   : > { %p213_p3 = scmp.lt.s32.totalorder %s1056_s23, 3  ;;  %s1323_s0 = sld [smem:[#allocation20_spill]] }
  0x23   : > { %s1060_s11 = smov [#allocation3]   ;;  %s1325_s2 = sld [smem:[#allocation22_spill]] }
  0x24   : > { %p1197_p5 = pnand %p693_p12, %p213_p3  ;;  %s229_s12 = sshll.u32 %s1060_s11, 4  ;;  %s230_s12 = int_to_ptr.vmem [resolvable:$true] %s229_s12 }
  0x25   : > { %s268_s16 = scalar_lea.vmem [#allocation8], %s1143_s29  ;;  %s1327_s1 = smov 64  }
  0x26   : > { %p769_p1 = pneg %p1197_p5  ;;  %s275_s17 = sshll.u32 %s268_s16, 4  ;;  %s276_s17 = int_to_ptr.vmem [resolvable:$true] %s275_s17 }
  0x27   : > { %s699_s11 = sshll.u32 %s1143_s29, 5  ;;  %s747_s24 = sshll.u32 %s1052_s22, 5 }
  0x28   : > { %s227_s9 = sshll.u32 %s1323_s0, 4  ;;  %p770_p6 = pnand %p769_p1, %p91_p9  ;;  %s228_s9 = int_to_ptr.hbm [resolvable:$true] %s227_s9 }
  0x29   : > { %s271_s7 = scalar_lea.hbm %s1325_s2, %s1052_s22  ;;  %s1326_s0 = smov 4  }
  0x2a   : > { %s273_s8 = sshll.u32 %s271_s7, 4  ;;  %s292_s26 = scalar_lea.hbm %s1299_s3, %s747_s24  ;;  %s274_s8 = int_to_ptr.hbm [resolvable:$true] %s273_s8 }
  0x2b   : > { %772 = dma.hbm_to_vmem [thread:$0]  (!%p770_p6), %s228_s9, 128, %s230_s12, [#allocation4], %s1327_s1, %s1327_s1, %s1326_s0  }
  0x2c   : > { %779 = dma.hbm_to_vmem [thread:$0]  (!%p1155_p7), %s274_s8, 16, %s276_s17, %s1159_s15  }
  0x2d   : > { %s286_s2 = scalar_lea.vmem [#allocation9], %s699_s11  ;;  %s293_s7 = sshll.u32 %s292_s26, 4  ;;  %s294_s7 = int_to_ptr.hbm [resolvable:$true] %s293_s7 }
  0x2e   : > { %s295_s20 = sshll.u32 %s286_s2, 4  ;;  %s283_s23 = scalar_lea.sflag [#allocation10], %s1143_s29  ;;  %s296_s20 = int_to_ptr.vmem [resolvable:$true] %s295_s20 }
  0x2f   : > { %782 = dma.hbm_to_vmem [thread:$0]  (!%p1155_p7), %s294_s7, 512, %s296_s20, %s283_s23, %s1327_s1, %s1327_s1, %s1326_s0  }
  0x30   : > { %316 = sbr.rel (%p1197_p5) target bundleno = 357 (0x165), region = 40 }
  0x35   : > { %1019 = dma.done.wait (%p91_p9), [#allocation4], 128  }
  0x36   : > { %1021 = vsyncadd (%p91_p9), [#allocation4], 4294967168  ;;  %s323_s2 = sand.u32 1, %s1168_s25   ;;  %s1235_s24 = sand.u32 1, %s1040_s19  }
  0x37   : > { %s704_s29 = sshll.u32 %s1235_s24, 4  ;;  %s324_s30 = scalar_lea.sflag [#allocation7], %s323_s2 }
  0x38   : > { %s327_s0 = scalar_lea.vmem [#allocation6], %s704_s29 }
  0x39   : > { %1023 = dma.done.wait (%p1178_p13), %s324_s30, 272  }
  0x3a   : > { %1025 = vsyncadd (%p1178_p13), %s324_s30, 4294967024  ;;  %s705_s1 = sshll.u32 %s1235_s24, 5  ;;  %s336_s20 = scalar_lea.vmem [#allocation8], %s1235_s24 }
  0x3b   : > { %s343_s23 = scalar_lea.sflag [#allocation10], %s1235_s24  ;;  %s346_s14 = scalar_lea.vmem [#allocation9], %s705_s1 }
  0x3c   : > { %1027 = dma.done.wait (%p1178_p13), %s343_s23, 512  }
  0x3d   : > { %1029 = vsyncadd (%p1178_p13), %s343_s23, 4294966784  ;;  %v750_v0 = vld [vmem:[%s327_s0 + $0x8] sm:$0xff]  ;;  %v749_v1 = vld [vmem:[%s327_s0] sm:$0xff]  ;;  %vm429_vm0 = vcmask 261120   ;;  %p390_p7 = scmp.lt.s32.totalorder %s1048_s21, 1  ;;  %vm451_vm1 = vcmask 519168  }
  0x3e   : > { %439 = vmatpush.bf16.msra.mxu0 %v750_v0  ;;  %v748_v2 = vld [vmem:[#allocation3] sm:$0xff]  ;;  %v753_v5 = vld [vmem:[%s346_s14 + $0x8] sm:$0xff]  ;;  %v752_v6 = vld [vmem:[%s346_s14] sm:$0xff]  ;;  %vm497_vm2 = vcmask 523264   ;;  %s756_s27 = sshll.u32 %s1048_s21, 4  ;;  %s388_s8 = scalar_lea.vmem [#allocation11], %s704_s29 }
  0x3f   : > { %s391_s15 = scalar_select %p390_p7, %s1048_s21, 1  ;;  %v755_v3 = vld [vmem:[%s346_s14 + $0x18] sm:$0xff]  ;;  %v754_v4 = vld [vmem:[%s346_s14 + $0x10] sm:$0xff]  ;;  %v844_v7 = vld [vmem:[%s336_s20] ss:$0 sm:$0xff] }
  0x40   : > { %505 = vmatpush.bf16.msra.mxu1 %v755_v3  ;;  %s532_s12 = scalar_lea.hbm %s1301_s5, %s756_s27  ;;  %s533_s11 = sshll.u32 %s388_s8, 4  ;;  %s534_s11 = int_to_ptr.vmem [resolvable:$true] %s533_s11 }
  0x41   : > { %s395_s25 = scalar_lea.vmem %s1300_s4, %s391_s15  ;;  %s535_s13 = sshll.u32 %s532_s12, 4  ;;  %s536_s13 = int_to_ptr.hbm [resolvable:$true] %s535_s13 }
  0x42   : > { %440 = vmatpush.bf16.msra.mxu0 %v749_v1  ;;  %v845_v17 = vld [vmem:[%s395_s25] ss:$0 sm:$0xff]  ;;  %s518_s26 = scalar_lea.sflag [#allocation5], %s1235_s24  ;;  %s980_s7 = sshra.s32 %s536_s13, 4  ;;  %s981_s7 = int_to_ptr.hbm [resolvable:$true] %s980_s7 }
  0x43   : > { %s982_s21 = scalar_lea.hbm %s981_s7, 16  ;;  %s986_s29 = scalar_lea.hbm %s1301_s5, 32 }
  0x44   : > { %506 = vmatpush.bf16.msra.mxu1 %v754_v4  ;;  %p983_p8 = scmp.ne.s32.totalorder %s981_s7, %s982_s21  ;;  %p987_p11 = scmp.lt.s32.totalorder %s981_s7, %s1301_s5 }
  0x45   : > { %719 = vmatmul.msk.bf16.vlgmr.msra.gmra.mxu0 %vm429_vm0, %v748_v2  ;;  %p988_p12 = scmp.lt.s32.totalorder %s986_s29, %s982_s21 }
  0x46   : > { %p984_p9 = pnand %p983_p8, %p1185_p0 }
  0x47   : > { %p989_p13 = por %p988_p12, %p987_p11 }
  0x48   : > { %507 = vmatpush.bf16.msra.mxu1 %v753_v5  ;;  %p985_p10 = pneg %p984_p9 }
  0x4a   : > { %p990_p3 = pnand %p989_p13, %p985_p10 }
  0x4c   : > { %508 = vmatpush.bf16.msra.mxu1 %v752_v6 }
  0xc2   : > { %v442_v8 = vpop.f32.mrf.mxu0 }
  0xc3   : > { %v443_v9 = vadd.f32 %v844_v7, %v442_v8 }
  0xc5   : > { %v447_v10 = vmax.f32 %v443_v9, 0.0 }
  0xc7   : > { %v449_v11 = vpack.c.bf16 %v447_v10, %v447_v10 }
  0xc9   : > { %452 = vst.msk [vmem:[#allocation2] sm:$0xf] %vm451_vm1, %v449_v11 }
  0xca   : > { %v444_v12 = vpop.f32.mrf.mxu0 }
  0xcb   : > { %v445_v13 = vadd.f32 %v844_v7, %v444_v12 }
  0xcd   : > { %v448_v14 = vmax.f32 %v445_v13, 0.0 }
  0xcf   : > { %v450_v15 = vpack.c.bf16 %v448_v14, %v448_v14 }
  0xd1   : > { %453 = vst.msk [vmem:[#allocation2 + $0x4] sm:$0xf] %vm451_vm1, %v450_v15 }
  0xd8   : > { %v751_v16 = vld [vmem:[#allocation2] sm:$0xff] }
  0xd9   : > { %740 = vmatmul.msk.bf16.vlgmr.msra.gmra.mxu1 %vm497_vm2, %v751_v16 }
 0x156   : > { %v510_v18 = vpop.f32.mrf.mxu1 }
 0x157   : > { %v511_v19 = vadd.f32 %v845_v17, %v510_v18 }
 0x159   : > { %515 = vst [vmem:[%s388_s8] sm:$0xff] %v511_v19 }
 0x15e   : > { %v512_v20 = vpop.f32.mrf.mxu1 }
 0x15f   : > { %v513_v21 = vadd.f32 %v845_v17, %v512_v20 }
 0x161   : > { %516 = vst [vmem:[%s388_s8 + $0x8] sm:$0xff] %v513_v21 }
 0x162   : > { %993 = shalt.err (!%p990_p3)
}
 0x163   : > { %s1061_s24 = smov 128   ;;  %s1062_s20 = smov 8  }
 0x164   : > { %767 = dma.vmem_to_hbm [thread:$0]  (%p1185_p0), %s534_s11, 256, %s536_s13, %s518_s26, %s1061_s24, %s1061_s24, %s1062_s20  }
 0x165 PF: > { %s1328_s23 = sld [smem:[#allocation17_spill]]  ;;  %s550_s14 = sand.u32 1, %s1036_s18  }
 0x166   : > { %p784_p5 = pnand %p695_p4, %p1189_p2  ;;  %s551_s15 = scalar_lea.sflag [#allocation5], %s550_s14 }
 0x168   : > { %p785_p1 = pneg %p784_p5 }
 0x16a   : > { %1031 = dma.done.wait (%p785_p1), %s551_s15, 256  }
 0x16b   : > { %1033 = vsyncadd (%p785_p1), %s551_s15, 4294967040  ;;  %s25_s23 = sadd.s32 1, %s1328_s23   ;;  %s1329_s16 = sld [smem:[#allocation16_spill]] }
 0x16c   : > { %p22_p6 = scmp.ge.s32.totalorder %s25_s23, 4   ;;  %s1330_s20 = sld [smem:[#allocation19_spill]] }
 0x16d   : > { %s1331_s28 = sld [smem:[#allocation18_spill]]  ;;  %s1332_s18 = smov %s1040_s19 }
 0x16e   : > { %s1334_s21 = smov %s1052_s22 }
 0x16f   :  { %24 = sbr.rel (!%p22_p6) target bundleno = 13 (0xd), region = 122 }
 0x171   : > { %s1333_s19 = smov %s1329_s16 }
 0x173   : > { %s1335_s22 = smov %s1331_s28 }
 0x174   :  { %557 = vsyncpa [#allocation4], 1 }
 0x175   :  { %559 = vsyncpa [#allocation4 + $0x1], 1 }
 0x176   :  { %560 = vsyncpa [#allocation7], 1 }
 0x177   :  { %562 = vsyncpa [#allocation7 + $0x1], 1 }
 0x178   :  { %563 = vsyncpa [#allocation10], 1 }
 0x179   :  { %565 = vsyncpa [#allocation10 + $0x1], 1 }
 0x17a   :  { %566 = vsyncpa [#allocation5], 1 }
 0x17b   :  { %568 = vsyncpa [#allocation5 + $0x1], 1 }

</bundles_post_ra>
